<compile_context>
chip_gen: v6e
topology: v6e:2x2x1
jax: 0.10.0
libtpu: 0.0.40
codegen_flags: <defaults>
</compile_context>

<pallas_src>
from functools import partial

import jax
import jax.numpy as jnp
from jax.experimental import pallas as pl
from jax.experimental.pallas import tpu as pltpu


def _attention_kernel(num_heads, head_dim,
                      emb_ref, mask_ref,
                      w_qkv_ref, b_qkv_ref,
                      wo_ref, bo_ref,
                      g_emb_ref, b_emb_ref, g_out_ref, b_out_ref,
                      out_ref,
                      xln_scr, q_scr, k_scr, v_scr):
    """Grid step == (batch element b, query tile qi).

    emb_ref   : (1, S, H)   f32  raw sum of word+position+token_type embeddings
    mask_ref  : (1, 1, S)   f32  additive extended attention mask
    w_qkv_ref : (H, 3H)     bf16 fused [Q(scaled) | K | V] weights, [in, out]
    b_qkv_ref : (1, 3H)     f32  fused QKV bias (Q part pre-scaled)
    wo_ref    : (H, H)      bf16 output-projection weights, [in, out]
    bo_ref    : (1, H)      f32  output-projection bias
    g/b *     : (1, H)      f32  LayerNorm weight / bias (embeddings LN, output LN)
    out_ref   : (1, tq, H)  f32  attention_output tile (post BertSelfOutput LN)

    scratch (persist across grid steps, recomputed at qi == 0 of every batch row):
    xln_scr   : (S, H)      f32  LayerNorm'd embeddings (residual + KV source)
    q/k/v_scr : (nH, S, dH) bf16 head-major projections
    """
    eps = 1e-12
    nH, dH = num_heads, head_dim
    S = emb_ref.shape[1]
    H = nH * dH
    tq = out_ref.shape[1]
    qi = pl.program_id(1)

    # ---------------- per-batch prologue: LN + flat QKV + head split ----------------
    @pl.when(qi == 0)
    def _prologue():
        x = emb_ref[0]                                            # (S, H) f32
        mu = jnp.mean(x, axis=-1, keepdims=True)
        var = jnp.mean((x - mu) ** 2, axis=-1, keepdims=True)
        x_ln = (x - mu) * jax.lax.rsqrt(var + eps) * g_emb_ref[...] + b_emb_ref[...]
        xln_scr[...] = x_ln

        # One full-width, H-deep MXU pass for Q, K and V together.
        qkv = jnp.dot(x_ln.astype(jnp.bfloat16), w_qkv_ref[...],
                      preferred_element_type=jnp.float32) + b_qkv_ref[...]   # (S, 3H)

        # One-time head split into head-major scratch (amortized over all query
        # tiles of this batch row).
        for n in range(nH):
            q_scr[n] = qkv[:, n * dH:(n + 1) * dH].astype(jnp.bfloat16)
            k_scr[n] = qkv[:, H + n * dH:H + (n + 1) * dH].astype(jnp.bfloat16)
            v_scr[n] = qkv[:, 2 * H + n * dH:2 * H + (n + 1) * dH].astype(jnp.bfloat16)

    # ---------------- per-query-tile attention ----------------
    q0 = pl.multiple_of(qi * tq, tq)
    q_blk = q_scr[:, pl.ds(q0, tq), :]                            # (nH, tq, dH) bf16
    x_ln_blk = xln_scr[pl.ds(q0, tq), :]                          # (tq, H) f32
    mask = mask_ref[0]                                            # (1, S) additive

    # scores (scale already folded into Q weights/bias)
    s = jnp.einsum('nqd,nkd->nqk', q_blk, k_scr[...],
                   preferred_element_type=jnp.float32) + mask     # (nH, tq, S)

    s_max = jnp.max(s, axis=-1, keepdims=True)
    p = jnp.exp(s - s_max)                                        # un-normalized probs
    denom = jnp.sum(p, axis=-1, keepdims=True)                    # (nH, tq, 1)

    ctx = jnp.einsum('nqk,nkd->nqd', p.astype(jnp.bfloat16), v_scr[...],
                     preferred_element_type=jnp.float32)          # (nH, tq, dH)
    ctx = ctx * pl.reciprocal(denom)                              # deferred softmax norm

    # Flatten heads back onto the lane axis and do ONE H-deep output projection.
    ctx_flat = jnp.concatenate([ctx[n] for n in range(nH)], axis=-1)       # (tq, H)
    attn = jnp.dot(ctx_flat.astype(jnp.bfloat16), wo_ref[...],
                   preferred_element_type=jnp.float32) + bo_ref[...]       # (tq, H)

    # residual + output LayerNorm
    y = attn + x_ln_blk
    mu2 = jnp.mean(y, axis=-1, keepdims=True)
    var2 = jnp.mean((y - mu2) ** 2, axis=-1, keepdims=True)
    out_ref[0] = (y - mu2) * jax.lax.rsqrt(var2 + eps) * g_out_ref[...] + b_out_ref[...]


def one_attention_encoder(input_ids, params,
                          attention_mask=None, token_type_ids=None,
                          position_ids=None):
    B, S = input_ids.shape
    H = params["word_emb"].shape[1]
    nH = params["num_heads"]
    dH = H // nH

    if attention_mask is None:
        attention_mask = jnp.ones((B, S), jnp.float32)
    if token_type_ids is None:
        token_type_ids = jnp.zeros((B, S), jnp.int32)
    if position_ids is None:
        position_ids = jnp.broadcast_to(jnp.arange(S, dtype=jnp.int32), (B, S))

    # TODO(synk): embedding-table gathers are data-dependent HBM gathers; kept as
    # plain-JAX glue outside the kernel.
    emb = (params["word_emb"][input_ids]
           + params["pos_emb"][position_ids]
           + params["type_emb"][token_type_ids]).astype(jnp.float32)      # (B,S,H)

    # HF get_extended_attention_mask: (1 - mask) * large_negative
    ext_mask = ((1.0 - attention_mask) * -10000.0).astype(jnp.float32).reshape(B, 1, S)

    # --- pack weights once in the wrapper ---
    scale = 1.0 / (dH ** 0.5)
    # fused QKV slab, [in, out]; 1/sqrt(dH) folded into the Q columns + Q bias
    w_qkv = jnp.concatenate([params["wq"] * scale, params["wk"], params["wv"]],
                            axis=1).astype(jnp.bfloat16)                  # (H, 3H)
    b_qkv = jnp.concatenate([params["bq"] * scale, params["bk"], params["bv"]]
                            ).reshape(1, 3 * H).astype(jnp.float32)       # (1, 3H)
    wo = params["wo"].astype(jnp.bfloat16)                                # (H, H)

    row = lambda p: p.reshape(1, H).astype(jnp.float32)

    # Query-axis tiling: tq=128 for realistic sequence lengths, full S otherwise.
    tq = 128 if (S % 128 == 0) else S
    nQ = S // tq

    const = lambda shape: pl.BlockSpec(shape, lambda b, q, _s=len(shape): (0,) * _s)

    out = pl.pallas_call(
        partial(_attention_kernel, nH, dH),
        out_shape=jax.ShapeDtypeStruct((B, S, H), jnp.float32),
        grid=(B, nQ),
        in_specs=[
            pl.BlockSpec((1, S, H), lambda b, q: (b, 0, 0)),   # full-seq embedding sum
            pl.BlockSpec((1, 1, S), lambda b, q: (b, 0, 0)),   # extended mask
            const((H, 3 * H)),                                 # fused QKV weights
            const((1, 3 * H)),                                 # fused QKV bias
            const((H, H)),                                     # output-proj weights
            const((1, H)),                                     # output-proj bias
            const((1, H)), const((1, H)),                      # emb LN gamma/beta
            const((1, H)), const((1, H)),                      # out LN gamma/beta
        ],
        out_specs=pl.BlockSpec((1, tq, H), lambda b, q: (b, q, 0)),
        scratch_shapes=[
            pltpu.VMEM((S, H), jnp.float32),                   # x_ln (residual + KV src)
            pltpu.VMEM((nH, S, dH), jnp.bfloat16),             # Q (head-major)
            pltpu.VMEM((nH, S, dH), jnp.bfloat16),             # K (head-major)
            pltpu.VMEM((nH, S, dH), jnp.bfloat16),             # V (head-major)
        ],
        compiler_params=pltpu.CompilerParams(
            dimension_semantics=("parallel", "arbitrary"),
            vmem_limit_bytes=64 * 1024 * 1024,
        ),
    )(emb, ext_mask,
      w_qkv, b_qkv,
      wo, row(params["bo"]),
      row(params["ln_emb_g"]), row(params["ln_emb_b"]),
      row(params["ln_out_g"]), row(params["ln_out_b"]))
    return out


def _reference(input_ids, params):
    """Pure-JAX f32 reference (mirrors the PyTorch forward) for a sanity check."""
    B, S = input_ids.shape
    H = params["word_emb"].shape[1]
    nH = params["num_heads"]
    dH = H // nH
    eps = 1e-12

    pos = jnp.broadcast_to(jnp.arange(S), (B, S))
    emb = (params["word_emb"][input_ids]
           + params["pos_emb"][pos]
           + params["type_emb"][jnp.zeros((B, S), jnp.int32)])

    def ln(x, g, b):
        mu = x.mean(-1, keepdims=True)
        var = ((x - mu) ** 2).mean(-1, keepdims=True)
        return (x - mu) * jax.lax.rsqrt(var + eps) * g + b

    x = ln(emb, params["ln_emb_g"], params["ln_emb_b"])
    q = x @ params["wq"] + params["bq"]
    k = x @ params["wk"] + params["bk"]
    v = x @ params["wv"] + params["bv"]
    q = q.reshape(B, S, nH, dH).transpose(0, 2, 1, 3)
    k = k.reshape(B, S, nH, dH).transpose(0, 2, 1, 3)
    v = v.reshape(B, S, nH, dH).transpose(0, 2, 1, 3)
    s = jnp.einsum("bhqd,bhkd->bhqk", q, k) / (dH ** 0.5)
    p = jax.nn.softmax(s, axis=-1)
    ctx = jnp.einsum("bhqk,bhkd->bhqd", p, v).transpose(0, 2, 1, 3).reshape(B, S, H)
    attn = ctx @ params["wo"] + params["bo"]
    return ln(attn + x, params["ln_out_g"], params["ln_out_b"])


def make_params(key, vocab=100, max_pos=16, type_vocab=2, hidden=32, num_heads=4):
    ks = jax.random.split(key, 8)
    n = lambda k, shape: (0.02 * jax.random.normal(k, shape)).astype(jnp.float32)
    return {
        "num_heads": num_heads,
        "word_emb": n(ks[0], (vocab, hidden)),
        "pos_emb": n(ks[1], (max_pos, hidden)),
        "type_emb": n(ks[2], (type_vocab, hidden)),
        # weights stored as [in, out] (pre-transposed vs PyTorch Linear)
        "wq": n(ks[3], (hidden, hidden)), "bq": jnp.zeros((hidden,), jnp.float32),
        "wk": n(ks[4], (hidden, hidden)), "bk": jnp.zeros((hidden,), jnp.float32),
        "wv": n(ks[5], (hidden, hidden)), "bv": jnp.zeros((hidden,), jnp.float32),
        "wo": n(ks[6], (hidden, hidden)), "bo": jnp.zeros((hidden,), jnp.float32),
        "ln_emb_g": jnp.ones((hidden,), jnp.float32),
        "ln_emb_b": jnp.zeros((hidden,), jnp.float32),
        "ln_out_g": jnp.ones((hidden,), jnp.float32),
        "ln_out_b": jnp.zeros((hidden,), jnp.float32),
    }


if __name__ == "__main__":
    key = jax.random.PRNGKey(0)
    k_par, k_ids = jax.random.split(key)

    # small shapes consistent with the module (single query tile per batch row)
    B, S, H, nH, vocab = 2, 8, 32, 4, 100
    params = make_params(k_par, vocab=vocab, max_pos=S, hidden=H, num_heads=nH)
    input_ids = jax.random.randint(k_ids, (B, S), 0, vocab, dtype=jnp.int32)

    out = jax.block_until_ready(one_attention_encoder(input_ids, params))
    ref = _reference(input_ids, params)
    assert out.shape == (B, S, H)
    # bf16 MXU inputs with f32 accumulation -> slightly looser parity vs f32 reference
    assert jnp.allclose(out, ref, atol=2e-2, rtol=2e-2), "mismatch vs reference (S=8)"

    # second config exercising the query-tiled path (S=256 -> tq=128, 2 tiles/row)
    S2 = 256
    params2 = make_params(k_par, vocab=vocab, max_pos=S2, hidden=H, num_heads=nH)
    input_ids2 = jax.random.randint(k_ids, (B, S2), 0, vocab, dtype=jnp.int32)
    out2 = jax.block_until_ready(one_attention_encoder(input_ids2, params2))
    ref2 = _reference(input_ids2, params2)
    assert out2.shape == (B, S2, H)
    assert jnp.allclose(out2, ref2, atol=2e-2, rtol=2e-2), "mismatch vs reference (S=256)"

    print("KERNEL_OK")
</pallas_src>

<mosaic_0001>
module attributes {stable_mosaic.version = 11 : i64} {
  func.func @_attention_kernel(%arg0: i32, %arg1: i32, %arg2: memref<1x8x32xf32, #tpu.memory_space<vmem>>, %arg3: memref<1x1x8xf32, #tpu.memory_space<vmem>>, %arg4: memref<32x96xbf16, #tpu.memory_space<vmem>>, %arg5: memref<1x96xf32, #tpu.memory_space<vmem>>, %arg6: memref<32x32xbf16, #tpu.memory_space<vmem>>, %arg7: memref<1x32xf32, #tpu.memory_space<vmem>>, %arg8: memref<1x32xf32, #tpu.memory_space<vmem>>, %arg9: memref<1x32xf32, #tpu.memory_space<vmem>>, %arg10: memref<1x32xf32, #tpu.memory_space<vmem>>, %arg11: memref<1x32xf32, #tpu.memory_space<vmem>>, %arg12: memref<1x8x32xf32, #tpu.memory_space<vmem>>, %arg13: memref<8x32xf32, #tpu.memory_space<vmem>>, %arg14: memref<4x8x8xbf16, #tpu.memory_space<vmem>>, %arg15: memref<4x8x8xbf16, #tpu.memory_space<vmem>>, %arg16: memref<4x8x8xbf16, #tpu.memory_space<vmem>>) attributes {dimension_semantics = [#tpu.dimension_semantics<parallel>, #tpu.dimension_semantics<arbitrary>], iteration_bounds = array<i64: 2, 1>, scalar_prefetch = 0 : i64, scratch_operands = 4 : i64, tpu.core_type = #tpu.core_type<tc>, window_params = [{transform_indices = @transform_0, window_bounds = array<i64: 1, 8, 32>}, {transform_indices = @transform_1, window_bounds = array<i64: 1, 1, 8>}, {pipeline_mode = #tpu.pipeline_mode<synchronous>, transform_indices = @transform_2, window_bounds = array<i64: 32, 96>}, {pipeline_mode = #tpu.pipeline_mode<synchronous>, transform_indices = @transform_3, window_bounds = array<i64: 1, 96>}, {pipeline_mode = #tpu.pipeline_mode<synchronous>, transform_indices = @transform_4, window_bounds = array<i64: 32, 32>}, {pipeline_mode = #tpu.pipeline_mode<synchronous>, transform_indices = @transform_5, window_bounds = array<i64: 1, 32>}, {pipeline_mode = #tpu.pipeline_mode<synchronous>, transform_indices = @transform_6, window_bounds = array<i64: 1, 32>}, {pipeline_mode = #tpu.pipeline_mode<synchronous>, transform_indices = @transform_7, window_bounds = array<i64: 1, 32>}, {pipeline_mode = #tpu.pipeline_mode<synchronous>, transform_indices = @transform_8, window_bounds = array<i64: 1, 32>}, {pipeline_mode = #tpu.pipeline_mode<synchronous>, transform_indices = @transform_9, window_bounds = array<i64: 1, 32>}, {transform_indices = @transform_10, window_bounds = array<i64: 1, 8, 32>}]} {
    %c0_i32 = arith.constant 0 : i32
    %0 = arith.cmpi eq, %arg1, %c0_i32 : i32
    %1 = arith.extui %0 : i1 to i32
    %c0_i32_0 = arith.constant 0 : i32
    %2 = arith.cmpi ne, %1, %c0_i32_0 : i32
    scf.if %2 {
      %c0_32 = arith.constant 0 : index
      %c0_33 = arith.constant 0 : index
      %c0_34 = arith.constant 0 : index
      %72 = vector.load %arg2[%c0_32, %c0_33, %c0_34] : memref<1x8x32xf32, #tpu.memory_space<vmem>>, vector<1x8x32xf32>
      %73 = vector.shape_cast %72 : vector<1x8x32xf32> to vector<8x32xf32>
      %cst_35 = arith.constant dense<0.000000e+00> : vector<8xf32>
      %74 = vector.multi_reduction <add>, %73, %cst_35 [1] : vector<8x32xf32> to vector<8xf32>
      %75 = vector.shape_cast %74 : vector<8xf32> to vector<8x1xf32>
      %cst_36 = arith.constant 3.200000e+01 : f32
      %76 = vector.broadcast %cst_36 : f32 to vector<8x1xf32>
      %77 = arith.divf %75, %76 : vector<8x1xf32>
      %78 = vector.broadcast %77 : vector<8x1xf32> to vector<8x32xf32>
      %79 = arith.subf %73, %78 : vector<8x32xf32>
      %80 = arith.mulf %79, %79 : vector<8x32xf32>
      %cst_37 = arith.constant dense<0.000000e+00> : vector<8xf32>
      %81 = vector.multi_reduction <add>, %80, %cst_37 [1] : vector<8x32xf32> to vector<8xf32>
      %82 = vector.shape_cast %81 : vector<8xf32> to vector<8x1xf32>
      %cst_38 = arith.constant 3.200000e+01 : f32
      %83 = vector.broadcast %cst_38 : f32 to vector<8x1xf32>
      %84 = arith.divf %82, %83 : vector<8x1xf32>
      %85 = vector.broadcast %77 : vector<8x1xf32> to vector<8x32xf32>
      %86 = arith.subf %73, %85 : vector<8x32xf32>
      %cst_39 = arith.constant 9.99999996E-13 : f32
      %87 = vector.broadcast %cst_39 : f32 to vector<8x1xf32>
      %88 = arith.addf %84, %87 : vector<8x1xf32>
      %89 = math.rsqrt %88 : vector<8x1xf32>
      %90 = vector.broadcast %89 : vector<8x1xf32> to vector<8x32xf32>
      %91 = arith.mulf %86, %90 : vector<8x32xf32>
      %c0_40 = arith.constant 0 : index
      %c0_41 = arith.constant 0 : index
      %92 = vector.load %arg8[%c0_40, %c0_41] : memref<1x32xf32, #tpu.memory_space<vmem>>, vector<1x32xf32>
      %93 = vector.broadcast %92 : vector<1x32xf32> to vector<8x32xf32>
      %94 = arith.mulf %91, %93 : vector<8x32xf32>
      %c0_42 = arith.constant 0 : index
      %c0_43 = arith.constant 0 : index
      %95 = vector.load %arg9[%c0_42, %c0_43] : memref<1x32xf32, #tpu.memory_space<vmem>>, vector<1x32xf32>
      %96 = vector.broadcast %95 : vector<1x32xf32> to vector<8x32xf32>
      %97 = arith.addf %94, %96 : vector<8x32xf32>
      %c0_44 = arith.constant 0 : index
      %c0_45 = arith.constant 0 : index
      %98 = vector.load %arg13[%c0_44, %c0_45] : memref<8x32xf32, #tpu.memory_space<vmem>>, vector<8x32xf32>
      tpu.vector_store %arg13[%c0_44, %c0_45], %97 {strides = array<i32>} : memref<8x32xf32, #tpu.memory_space<vmem>>, vector<8x32xf32>,
      %99 = arith.truncf %97 : vector<8x32xf32> to vector<8x32xbf16>
      %c0_46 = arith.constant 0 : index
      %c0_47 = arith.constant 0 : index
      %100 = vector.load %arg4[%c0_46, %c0_47] : memref<32x96xbf16, #tpu.memory_space<vmem>>, vector<32x96xbf16>
      %cst_48 = arith.constant dense<0.000000e+00> : vector<8x96xf32>
      %101 = tpu.matmul %99, %100, %cst_48 {dimension_numbers = #tpu.dot_dimension_numbers<[1], [0], [0], [1], [0, 0, 1, 1], [], []>} : vector<8x32xbf16>, vector<32x96xbf16>, vector<8x96xf32> -> vector<8x96xf32>
      %c0_49 = arith.constant 0 : index
      %c0_50 = arith.constant 0 : index
      %102 = vector.load %arg5[%c0_49, %c0_50] : memref<1x96xf32, #tpu.memory_space<vmem>>, vector<1x96xf32>
      %103 = vector.broadcast %102 : vector<1x96xf32> to vector<8x96xf32>
      %104 = arith.addf %101, %103 : vector<8x96xf32>
      %105 = vector.extract_strided_slice %104 {offsets = [0, 0], sizes = [8, 8], strides = [1, 1]} : vector<8x96xf32> to vector<8x8xf32>
      %106 = arith.truncf %105 : vector<8x8xf32> to vector<8x8xbf16>
      %c0_51 = arith.constant 0 : index
      %c0_52 = arith.constant 0 : index
      %c0_53 = arith.constant 0 : index
      %107 = vector.load %arg14[%c0_51, %c0_52, %c0_53] : memref<4x8x8xbf16, #tpu.memory_space<vmem>>, vector<1x8x8xbf16>
      %108 = vector.shape_cast %107 : vector<1x8x8xbf16> to vector<8x8xbf16>
      %109 = vector.shape_cast %106 : vector<8x8xbf16> to vector<1x8x8xbf16>
      tpu.vector_store %arg14[%c0_51, %c0_52, %c0_53], %109 {strides = array<i32>} : memref<4x8x8xbf16, #tpu.memory_space<vmem>>, vector<1x8x8xbf16>,
      %110 = vector.extract_strided_slice %104 {offsets = [0, 32], sizes = [8, 8], strides = [1, 1]} : vector<8x96xf32> to vector<8x8xf32>
      %111 = arith.truncf %110 : vector<8x8xf32> to vector<8x8xbf16>
      %c0_54 = arith.constant 0 : index
      %c0_55 = arith.constant 0 : index
      %c0_56 = arith.constant 0 : index
      %112 = vector.load %arg15[%c0_54, %c0_55, %c0_56] : memref<4x8x8xbf16, #tpu.memory_space<vmem>>, vector<1x8x8xbf16>
      %113 = vector.shape_cast %112 : vector<1x8x8xbf16> to vector<8x8xbf16>
      %114 = vector.shape_cast %111 : vector<8x8xbf16> to vector<1x8x8xbf16>
      tpu.vector_store %arg15[%c0_54, %c0_55, %c0_56], %114 {strides = array<i32>} : memref<4x8x8xbf16, #tpu.memory_space<vmem>>, vector<1x8x8xbf16>,
      %115 = vector.extract_strided_slice %104 {offsets = [0, 64], sizes = [8, 8], strides = [1, 1]} : vector<8x96xf32> to vector<8x8xf32>
      %116 = arith.truncf %115 : vector<8x8xf32> to vector<8x8xbf16>
      %c0_57 = arith.constant 0 : index
      %c0_58 = arith.constant 0 : index
      %c0_59 = arith.constant 0 : index
      %117 = vector.load %arg16[%c0_57, %c0_58, %c0_59] : memref<4x8x8xbf16, #tpu.memory_space<vmem>>, vector<1x8x8xbf16>
      %118 = vector.shape_cast %117 : vector<1x8x8xbf16> to vector<8x8xbf16>
      %119 = vector.shape_cast %116 : vector<8x8xbf16> to vector<1x8x8xbf16>
      tpu.vector_store %arg16[%c0_57, %c0_58, %c0_59], %119 {strides = array<i32>} : memref<4x8x8xbf16, #tpu.memory_space<vmem>>, vector<1x8x8xbf16>,
      %120 = vector.extract_strided_slice %104 {offsets = [0, 8], sizes = [8, 8], strides = [1, 1]} : vector<8x96xf32> to vector<8x8xf32>
      %121 = arith.truncf %120 : vector<8x8xf32> to vector<8x8xbf16>
      %c1 = arith.constant 1 : index
      %c0_60 = arith.constant 0 : index
      %c0_61 = arith.constant 0 : index
      %122 = vector.load %arg14[%c1, %c0_60, %c0_61] : memref<4x8x8xbf16, #tpu.memory_space<vmem>>, vector<1x8x8xbf16>
      %123 = vector.shape_cast %122 : vector<1x8x8xbf16> to vector<8x8xbf16>
      %124 = vector.shape_cast %121 : vector<8x8xbf16> to vector<1x8x8xbf16>
      tpu.vector_store %arg14[%c1, %c0_60, %c0_61], %124 {strides = array<i32>} : memref<4x8x8xbf16, #tpu.memory_space<vmem>>, vector<1x8x8xbf16>,
      %125 = vector.extract_strided_slice %104 {offsets = [0, 40], sizes = [8, 8], strides = [1, 1]} : vector<8x96xf32> to vector<8x8xf32>
      %126 = arith.truncf %125 : vector<8x8xf32> to vector<8x8xbf16>
      %c1_62 = arith.constant 1 : index
      %c0_63 = arith.constant 0 : index
      %c0_64 = arith.constant 0 : index
      %127 = vector.load %arg15[%c1_62, %c0_63, %c0_64] : memref<4x8x8xbf16, #tpu.memory_space<vmem>>, vector<1x8x8xbf16>
      %128 = vector.shape_cast %127 : vector<1x8x8xbf16> to vector<8x8xbf16>
      %129 = vector.shape_cast %126 : vector<8x8xbf16> to vector<1x8x8xbf16>
      tpu.vector_store %arg15[%c1_62, %c0_63, %c0_64], %129 {strides = array<i32>} : memref<4x8x8xbf16, #tpu.memory_space<vmem>>, vector<1x8x8xbf16>,
      %130 = vector.extract_strided_slice %104 {offsets = [0, 72], sizes = [8, 8], strides = [1, 1]} : vector<8x96xf32> to vector<8x8xf32>
      %131 = arith.truncf %130 : vector<8x8xf32> to vector<8x8xbf16>
      %c1_65 = arith.constant 1 : index
      %c0_66 = arith.constant 0 : index
      %c0_67 = arith.constant 0 : index
      %132 = vector.load %arg16[%c1_65, %c0_66, %c0_67] : memref<4x8x8xbf16, #tpu.memory_space<vmem>>, vector<1x8x8xbf16>
      %133 = vector.shape_cast %132 : vector<1x8x8xbf16> to vector<8x8xbf16>
      %134 = vector.shape_cast %131 : vector<8x8xbf16> to vector<1x8x8xbf16>
      tpu.vector_store %arg16[%c1_65, %c0_66, %c0_67], %134 {strides = array<i32>} : memref<4x8x8xbf16, #tpu.memory_space<vmem>>, vector<1x8x8xbf16>,
      %135 = vector.extract_strided_slice %104 {offsets = [0, 16], sizes = [8, 8], strides = [1, 1]} : vector<8x96xf32> to vector<8x8xf32>
      %136 = arith.truncf %135 : vector<8x8xf32> to vector<8x8xbf16>
      %c2 = arith.constant 2 : index
      %c0_68 = arith.constant 0 : index
      %c0_69 = arith.constant 0 : index
      %137 = vector.load %arg14[%c2, %c0_68, %c0_69] : memref<4x8x8xbf16, #tpu.memory_space<vmem>>, vector<1x8x8xbf16>
      %138 = vector.shape_cast %137 : vector<1x8x8xbf16> to vector<8x8xbf16>
      %139 = vector.shape_cast %136 : vector<8x8xbf16> to vector<1x8x8xbf16>
      tpu.vector_store %arg14[%c2, %c0_68, %c0_69], %139 {strides = array<i32>} : memref<4x8x8xbf16, #tpu.memory_space<vmem>>, vector<1x8x8xbf16>,
      %140 = vector.extract_strided_slice %104 {offsets = [0, 48], sizes = [8, 8], strides = [1, 1]} : vector<8x96xf32> to vector<8x8xf32>
      %141 = arith.truncf %140 : vector<8x8xf32> to vector<8x8xbf16>
      %c2_70 = arith.constant 2 : index
      %c0_71 = arith.constant 0 : index
      %c0_72 = arith.constant 0 : index
      %142 = vector.load %arg15[%c2_70, %c0_71, %c0_72] : memref<4x8x8xbf16, #tpu.memory_space<vmem>>, vector<1x8x8xbf16>
      %143 = vector.shape_cast %142 : vector<1x8x8xbf16> to vector<8x8xbf16>
      %144 = vector.shape_cast %141 : vector<8x8xbf16> to vector<1x8x8xbf16>
      tpu.vector_store %arg15[%c2_70, %c0_71, %c0_72], %144 {strides = array<i32>} : memref<4x8x8xbf16, #tpu.memory_space<vmem>>, vector<1x8x8xbf16>,
      %145 = vector.extract_strided_slice %104 {offsets = [0, 80], sizes = [8, 8], strides = [1, 1]} : vector<8x96xf32> to vector<8x8xf32>
      %146 = arith.truncf %145 : vector<8x8xf32> to vector<8x8xbf16>
      %c2_73 = arith.constant 2 : index
      %c0_74 = arith.constant 0 : index
      %c0_75 = arith.constant 0 : index
      %147 = vector.load %arg16[%c2_73, %c0_74, %c0_75] : memref<4x8x8xbf16, #tpu.memory_space<vmem>>, vector<1x8x8xbf16>
      %148 = vector.shape_cast %147 : vector<1x8x8xbf16> to vector<8x8xbf16>
      %149 = vector.shape_cast %146 : vector<8x8xbf16> to vector<1x8x8xbf16>
      tpu.vector_store %arg16[%c2_73, %c0_74, %c0_75], %149 {strides = array<i32>} : memref<4x8x8xbf16, #tpu.memory_space<vmem>>, vector<1x8x8xbf16>,
      %150 = vector.extract_strided_slice %104 {offsets = [0, 24], sizes = [8, 8], strides = [1, 1]} : vector<8x96xf32> to vector<8x8xf32>
      %151 = arith.truncf %150 : vector<8x8xf32> to vector<8x8xbf16>
      %c3 = arith.constant 3 : index
      %c0_76 = arith.constant 0 : index
      %c0_77 = arith.constant 0 : index
      %152 = vector.load %arg14[%c3, %c0_76, %c0_77] : memref<4x8x8xbf16, #tpu.memory_space<vmem>>, vector<1x8x8xbf16>
      %153 = vector.shape_cast %152 : vector<1x8x8xbf16> to vector<8x8xbf16>
      %154 = vector.shape_cast %151 : vector<8x8xbf16> to vector<1x8x8xbf16>
      tpu.vector_store %arg14[%c3, %c0_76, %c0_77], %154 {strides = array<i32>} : memref<4x8x8xbf16, #tpu.memory_space<vmem>>, vector<1x8x8xbf16>,
      %155 = vector.extract_strided_slice %104 {offsets = [0, 56], sizes = [8, 8], strides = [1, 1]} : vector<8x96xf32> to vector<8x8xf32>
      %156 = arith.truncf %155 : vector<8x8xf32> to vector<8x8xbf16>
      %c3_78 = arith.constant 3 : index
      %c0_79 = arith.constant 0 : index
      %c0_80 = arith.constant 0 : index
      %157 = vector.load %arg15[%c3_78, %c0_79, %c0_80] : memref<4x8x8xbf16, #tpu.memory_space<vmem>>, vector<1x8x8xbf16>
      %158 = vector.shape_cast %157 : vector<1x8x8xbf16> to vector<8x8xbf16>
      %159 = vector.shape_cast %156 : vector<8x8xbf16> to vector<1x8x8xbf16>
      tpu.vector_store %arg15[%c3_78, %c0_79, %c0_80], %159 {strides = array<i32>} : memref<4x8x8xbf16, #tpu.memory_space<vmem>>, vector<1x8x8xbf16>,
      %160 = vector.extract_strided_slice %104 {offsets = [0, 88], sizes = [8, 8], strides = [1, 1]} : vector<8x96xf32> to vector<8x8xf32>
      %161 = arith.truncf %160 : vector<8x8xf32> to vector<8x8xbf16>
      %c3_81 = arith.constant 3 : index
      %c0_82 = arith.constant 0 : index
      %c0_83 = arith.constant 0 : index
      %162 = vector.load %arg16[%c3_81, %c0_82, %c0_83] : memref<4x8x8xbf16, #tpu.memory_space<vmem>>, vector<1x8x8xbf16>
      %163 = vector.shape_cast %162 : vector<1x8x8xbf16> to vector<8x8xbf16>
      %164 = vector.shape_cast %161 : vector<8x8xbf16> to vector<1x8x8xbf16>
      tpu.vector_store %arg16[%c3_81, %c0_82, %c0_83], %164 {strides = array<i32>} : memref<4x8x8xbf16, #tpu.memory_space<vmem>>, vector<1x8x8xbf16>,
    } else {
    }
    %c8_i32 = arith.constant 8 : i32
    %3 = arith.muli %arg1, %c8_i32 : i32
    %4 = tpu.assume_multiple %3, 8 : i32
    %c0 = arith.constant 0 : index
    %5 = arith.index_cast %4 : i32 to index
    %c0_1 = arith.constant 0 : index
    %6 = vector.load %arg14[%c0, %5, %c0_1] : memref<4x8x8xbf16, #tpu.memory_space<vmem>>, vector<4x8x8xbf16>
    %7 = arith.index_cast %4 : i32 to index
    %c0_2 = arith.constant 0 : index
    %8 = vector.load %arg13[%7, %c0_2] : memref<8x32xf32, #tpu.memory_space<vmem>>, vector<8x32xf32>
    %c0_3 = arith.constant 0 : index
    %c0_4 = arith.constant 0 : index
    %c0_5 = arith.constant 0 : index
    %9 = vector.load %arg3[%c0_3, %c0_4, %c0_5] : memref<1x1x8xf32, #tpu.memory_space<vmem>>, vector<1x1x8xf32>
    %10 = vector.shape_cast %9 : vector<1x1x8xf32> to vector<1x8xf32>
    %c0_6 = arith.constant 0 : index
    %c0_7 = arith.constant 0 : index
    %c0_8 = arith.constant 0 : index
    %11 = vector.load %arg15[%c0_6, %c0_7, %c0_8] : memref<4x8x8xbf16, #tpu.memory_space<vmem>>, vector<4x8x8xbf16>
    "tpu.trace_start"() <{level = 10 : i32, message = "nqd,nkd->nqk"}> : () -> ()
    %cst = arith.constant dense<0.000000e+00> : vector<4x8x8xf32>
    %12 = tpu.matmul %6, %11, %cst {dimension_numbers = #tpu.dot_dimension_numbers<[2], [2], [1], [1], [0, 0, 0, 1, 1, 1], [0], [0]>} : vector<4x8x8xbf16>, vector<4x8x8xbf16>, vector<4x8x8xf32> -> vector<4x8x8xf32>
    "tpu.trace_stop"() : () -> ()
    %13 = vector.shape_cast %10 : vector<1x8xf32> to vector<1x1x8xf32>
    %14 = vector.broadcast %13 : vector<1x1x8xf32> to vector<4x8x8xf32>
    %15 = arith.addf %12, %14 : vector<4x8x8xf32>
    %cst_9 = arith.constant dense<0xFF800000> : vector<4x8xf32>
    %16 = vector.multi_reduction <maximumf>, %15, %cst_9 [2] : vector<4x8x8xf32> to vector<4x8xf32>
    %17 = vector.shape_cast %16 : vector<4x8xf32> to vector<4x8x1xf32>
    %18 = vector.broadcast %17 : vector<4x8x1xf32> to vector<4x8x8xf32>
    %19 = arith.subf %15, %18 : vector<4x8x8xf32>
    %20 = math.exp %19 : vector<4x8x8xf32>
    %cst_10 = arith.constant dense<0.000000e+00> : vector<4x8xf32>
    %21 = vector.multi_reduction <add>, %20, %cst_10 [2] : vector<4x8x8xf32> to vector<4x8xf32>
    %22 = vector.shape_cast %21 : vector<4x8xf32> to vector<4x8x1xf32>
    %23 = arith.truncf %20 : vector<4x8x8xf32> to vector<4x8x8xbf16>
    %c0_11 = arith.constant 0 : index
    %c0_12 = arith.constant 0 : index
    %c0_13 = arith.constant 0 : index
    %24 = vector.load %arg16[%c0_11, %c0_12, %c0_13] : memref<4x8x8xbf16, #tpu.memory_space<vmem>>, vector<4x8x8xbf16>
    "tpu.trace_start"() <{level = 10 : i32, message = "nqk,nkd->nqd"}> : () -> ()
    %cst_14 = arith.constant dense<0.000000e+00> : vector<4x8x8xf32>
    %25 = tpu.matmul %23, %24, %cst_14 {dimension_numbers = #tpu.dot_dimension_numbers<[2], [1], [1], [2], [0, 0, 0, 1, 1, 2], [0], [0]>} : vector<4x8x8xbf16>, vector<4x8x8xbf16>, vector<4x8x8xf32> -> vector<4x8x8xf32>
    "tpu.trace_stop"() : () -> ()
    %26 = tpu.reciprocal %22 : vector<4x8x1xf32> -> vector<4x8x1xf32>
    %27 = vector.broadcast %26 : vector<4x8x1xf32> to vector<4x8x8xf32>
    %28 = arith.mulf %25, %27 : vector<4x8x8xf32>
    %29 = vector.extract_strided_slice %28 {offsets = [0, 0, 0], sizes = [1, 8, 8], strides = [1, 1, 1]} : vector<4x8x8xf32> to vector<1x8x8xf32>
    %30 = vector.shape_cast %29 : vector<1x8x8xf32> to vector<8x8xf32>
    %31 = vector.extract_strided_slice %28 {offsets = [1, 0, 0], sizes = [1, 8, 8], strides = [1, 1, 1]} : vector<4x8x8xf32> to vector<1x8x8xf32>
    %32 = vector.shape_cast %31 : vector<1x8x8xf32> to vector<8x8xf32>
    %33 = vector.extract_strided_slice %28 {offsets = [2, 0, 0], sizes = [1, 8, 8], strides = [1, 1, 1]} : vector<4x8x8xf32> to vector<1x8x8xf32>
    %34 = vector.shape_cast %33 : vector<1x8x8xf32> to vector<8x8xf32>
    %35 = vector.extract_strided_slice %28 {offsets = [3, 0, 0], sizes = [1, 8, 8], strides = [1, 1, 1]} : vector<4x8x8xf32> to vector<1x8x8xf32>
    %36 = vector.shape_cast %35 : vector<1x8x8xf32> to vector<8x8xf32>
    %37 = tpu.concatenate %30, %32, %34, %36 in 1 : vector<8x8xf32>, vector<8x8xf32>, vector<8x8xf32>, vector<8x8xf32> -> vector<8x32xf32>
    %38 = arith.truncf %37 : vector<8x32xf32> to vector<8x32xbf16>
    %c0_15 = arith.constant 0 : index
    %c0_16 = arith.constant 0 : index
    %39 = vector.load %arg6[%c0_15, %c0_16] : memref<32x32xbf16, #tpu.memory_space<vmem>>, vector<32x32xbf16>
    %cst_17 = arith.constant dense<0.000000e+00> : vector<8x32xf32>
    %40 = tpu.matmul %38, %39, %cst_17 {dimension_numbers = #tpu.dot_dimension_numbers<[1], [0], [0], [1], [0, 0, 1, 1], [], []>} : vector<8x32xbf16>, vector<32x32xbf16>, vector<8x32xf32> -> vector<8x32xf32>
    %c0_18 = arith.constant 0 : index
    %c0_19 = arith.constant 0 : index
    %41 = vector.load %arg7[%c0_18, %c0_19] : memref<1x32xf32, #tpu.memory_space<vmem>>, vector<1x32xf32>
    %42 = vector.broadcast %41 : vector<1x32xf32> to vector<8x32xf32>
    %43 = arith.addf %40, %42 : vector<8x32xf32>
    %44 = arith.addf %43, %8 : vector<8x32xf32>
    %cst_20 = arith.constant dense<0.000000e+00> : vector<8xf32>
    %45 = vector.multi_reduction <add>, %44, %cst_20 [1] : vector<8x32xf32> to vector<8xf32>
    %46 = vector.shape_cast %45 : vector<8xf32> to vector<8x1xf32>
    %cst_21 = arith.constant 3.200000e+01 : f32
    %47 = vector.broadcast %cst_21 : f32 to vector<8x1xf32>
    %48 = arith.divf %46, %47 : vector<8x1xf32>
    %49 = vector.broadcast %48 : vector<8x1xf32> to vector<8x32xf32>
    %50 = arith.subf %44, %49 : vector<8x32xf32>
    %51 = arith.mulf %50, %50 : vector<8x32xf32>
    %cst_22 = arith.constant dense<0.000000e+00> : vector<8xf32>
    %52 = vector.multi_reduction <add>, %51, %cst_22 [1] : vector<8x32xf32> to vector<8xf32>
    %53 = vector.shape_cast %52 : vector<8xf32> to vector<8x1xf32>
    %cst_23 = arith.constant 3.200000e+01 : f32
    %54 = vector.broadcast %cst_23 : f32 to vector<8x1xf32>
    %55 = arith.divf %53, %54 : vector<8x1xf32>
    %56 = vector.broadcast %48 : vector<8x1xf32> to vector<8x32xf32>
    %57 = arith.subf %44, %56 : vector<8x32xf32>
    %cst_24 = arith.constant 9.99999996E-13 : f32
    %58 = vector.broadcast %cst_24 : f32 to vector<8x1xf32>
    %59 = arith.addf %55, %58 : vector<8x1xf32>
    %60 = math.rsqrt %59 : vector<8x1xf32>
    %61 = vector.broadcast %60 : vector<8x1xf32> to vector<8x32xf32>
    %62 = arith.mulf %57, %61 : vector<8x32xf32>
    %c0_25 = arith.constant 0 : index
    %c0_26 = arith.constant 0 : index
    %63 = vector.load %arg10[%c0_25, %c0_26] : memref<1x32xf32, #tpu.memory_space<vmem>>, vector<1x32xf32>
    %64 = vector.broadcast %63 : vector<1x32xf32> to vector<8x32xf32>
    %65 = arith.mulf %62, %64 : vector<8x32xf32>
    %c0_27 = arith.constant 0 : index
    %c0_28 = arith.constant 0 : index
    %66 = vector.load %arg11[%c0_27, %c0_28] : memref<1x32xf32, #tpu.memory_space<vmem>>, vector<1x32xf32>
    %67 = vector.broadcast %66 : vector<1x32xf32> to vector<8x32xf32>
    %68 = arith.addf %65, %67 : vector<8x32xf32>
    %c0_29 = arith.constant 0 : index
    %c0_30 = arith.constant 0 : index
    %c0_31 = arith.constant 0 : index
    %69 = vector.load %arg12[%c0_29, %c0_30, %c0_31] : memref<1x8x32xf32, #tpu.memory_space<vmem>>, vector<1x8x32xf32>
    %70 = vector.shape_cast %69 : vector<1x8x32xf32> to vector<8x32xf32>
    %71 = vector.shape_cast %68 : vector<8x32xf32> to vector<1x8x32xf32>
    tpu.vector_store %arg12[%c0_29, %c0_30, %c0_31], %71 {strides = array<i32>} : memref<1x8x32xf32, #tpu.memory_space<vmem>>, vector<1x8x32xf32>,
    return
  }
  func.func @transform_0(%arg0: i32, %arg1: i32) -> (i32, i32, i32) {
    %c0_i32 = arith.constant 0 : i32
    %c0_i32_0 = arith.constant 0 : i32
    %c0_i32_1 = arith.constant 0 : i32
    return %arg0, %c0_i32, %c0_i32_0 : i32, i32, i32
  }
  func.func @transform_1(%arg0: i32, %arg1: i32) -> (i32, i32, i32) {
    %c0_i32 = arith.constant 0 : i32
    %c0_i32_0 = arith.constant 0 : i32
    %c0_i32_1 = arith.constant 0 : i32
    return %arg0, %c0_i32, %c0_i32_0 : i32, i32, i32
  }
  func.func @transform_2(%arg0: i32, %arg1: i32) -> (i32, i32) {
    %c0_i32 = arith.constant 0 : i32
    %c0_i32_0 = arith.constant 0 : i32
    %c0_i32_1 = arith.constant 0 : i32
    return %c0_i32, %c0_i32_0 : i32, i32
  }
  func.func @transform_3(%arg0: i32, %arg1: i32) -> (i32, i32) {
    %c0_i32 = arith.constant 0 : i32
    %c0_i32_0 = arith.constant 0 : i32
    %c0_i32_1 = arith.constant 0 : i32
    return %c0_i32, %c0_i32_0 : i32, i32
  }
  func.func @transform_4(%arg0: i32, %arg1: i32) -> (i32, i32) {
    %c0_i32 = arith.constant 0 : i32
    %c0_i32_0 = arith.constant 0 : i32
    %c0_i32_1 = arith.constant 0 : i32
    return %c0_i32, %c0_i32_0 : i32, i32
  }
  func.func @transform_5(%arg0: i32, %arg1: i32) -> (i32, i32) {
    %c0_i32 = arith.constant 0 : i32
    %c0_i32_0 = arith.constant 0 : i32
    %c0_i32_1 = arith.constant 0 : i32
    return %c0_i32, %c0_i32_0 : i32, i32
  }
  func.func @transform_6(%arg0: i32, %arg1: i32) -> (i32, i32) {
    %c0_i32 = arith.constant 0 : i32
    %c0_i32_0 = arith.constant 0 : i32
    %c0_i32_1 = arith.constant 0 : i32
    return %c0_i32, %c0_i32_0 : i32, i32
  }
  func.func @transform_7(%arg0: i32, %arg1: i32) -> (i32, i32) {
    %c0_i32 = arith.constant 0 : i32
    %c0_i32_0 = arith.constant 0 : i32
    %c0_i32_1 = arith.constant 0 : i32
    return %c0_i32, %c0_i32_0 : i32, i32
  }
  func.func @transform_8(%arg0: i32, %arg1: i32) -> (i32, i32) {
    %c0_i32 = arith.constant 0 : i32
    %c0_i32_0 = arith.constant 0 : i32
    %c0_i32_1 = arith.constant 0 : i32
    return %c0_i32, %c0_i32_0 : i32, i32
  }
  func.func @transform_9(%arg0: i32, %arg1: i32) -> (i32, i32) {
    %c0_i32 = arith.constant 0 : i32
    %c0_i32_0 = arith.constant 0 : i32
    %c0_i32_1 = arith.constant 0 : i32
    return %c0_i32, %c0_i32_0 : i32, i32
  }
  func.func @transform_10(%arg0: i32, %arg1: i32) -> (i32, i32, i32) {
    %c0_i32 = arith.constant 0 : i32
    %c0_i32_0 = arith.constant 0 : i32
    return %arg0, %arg1, %c0_i32 : i32, i32, i32
  }
}

</mosaic_0001>

<bundles_post_ra>
// kernel: tpu_custom_call.1
= control target key start
LH: loop header
LB: loop body
LE: loop exit
PB: predicated region body
PF: predicated region fallthrough
CT: control target
= control target key end

     0   :  { %s2164_s0 = inlined_call_operand.hbm [shape: f32[2,8,32], index: 0, kind: input, shape index: {}]   ;;  %s2165_s1 = inlined_call_operand.hbm [shape: f32[2,1,8], index: 1, kind: input, shape index: {}]   ;;  %s2166_s2 = inlined_call_operand.hbm [shape: bf16[32,96], index: 2, kind: input, shape index: {}]   ;;  %s2167_s3 = inlined_call_operand.vmem [shape: f32[1,96], index: 3, kind: input, shape index: {}]   ;;  %s2168_s4 = inlined_call_operand.hbm [shape: bf16[32,32], index: 4, kind: input, shape index: {}]   ;;  %s2169_s5 = inlined_call_operand.vmem [shape: f32[1,32], index: 5, kind: input, shape index: {}]   ;;  %s2170_s6 = inlined_call_operand.vmem [shape: f32[1,32], index: 6, kind: input, shape index: {}]   ;;  %s2171_s7 = inlined_call_operand.vmem [shape: f32[1,32], index: 7, kind: input, shape index: {}]   ;;  %s2172_s8 = inlined_call_operand.vmem [shape: f32[1,32], index: 8, kind: input, shape index: {}]   ;;  %s2173_s9 = inlined_call_operand.vmem [shape: f32[1,32], index: 9, kind: input, shape index: {}]   ;;  %s2174_s10 = inlined_call_operand.hbm [shape: f32[2,8,32], index: 10, kind: output, shape index: {}]  }
   0x1   :  { %2183 = sst [smem:[#allocation26_spill]] %s2164_s0 }
   0x2   :  { %2184 = sst [smem:[#allocation27_spill]] %s2166_s2 }
   0x3   :  { %2185 = sst [smem:[#allocation28_spill]] %s2168_s4 }
   0x4   :  { %2186 = sst [smem:[#allocation29_spill]] %s2174_s10 }
   0x5   :  { %15 = vsyncpa [#allocation7], 0 }
   0x6   :  { %17 = vsyncpa [#allocation7 + $0x1], 0 }
   0x7   :  { %18 = vsyncpa [#allocation10], 0 }
   0x8   :  { %20 = vsyncpa [#allocation10 + $0x1], 0 }
   0x9   :  { %21 = vsyncpa [#allocation13], 0 }
   0xa   :  { %22 = vsyncpa [#allocation8], 0 }
   0xb   :  { %24 = vsyncpa [#allocation8 + $0x1], 0  ;;  %s1851_s13 = smov 0   ;;  %s1853_s14 = smov 0  }
   0xc   :  { %s1855_s15 = smov 0   ;;  %s1857_s16 = smov 0  }
   0xd   :  { %s1859_s17 = smov 0   ;;  %s1861_s18 = smov 0  }
   0xe LB: > { %2187 = sst [smem:[#allocation20_spill]] %s1751_s13  ;;  %s1882_s19 = sadd.s32 4294967295, %s1771_s18   ;;  %s1771_s18 = sphi %s1861_s18, %s30_s18   ;;  %s1767_s17 = sphi %s1859_s17, %s2220_s17   ;;  %s1763_s16 = sphi %s1857_s16, %s2219_s16   ;;  %s1759_s15 = sphi %s1855_s15, %s2215_s15   ;;  %s1755_s14 = sphi %s1853_s14, %s2218_s14   ;;  %s1751_s13 = sphi %s1851_s13, %s2217_s13  }
   0xf   : > { %2188 = sst [smem:[#allocation21_spill]] %s1759_s15  ;;  %s1315_s20 = sadd.s32 4294967294, %s1771_s18  }
  0x10   : > { %2189 = sst [smem:[#allocation22_spill]] %s1771_s18  ;;  %p62_p0 = scmp.ne.s32.totalorder %s1755_s14, %s1751_s13 }
  0x11   : > { %p2175_p1 = scmp.eq.s32.totalorder %s1882_s19, 0  ;;  %p288_p3 = scmp.eq.s32.totalorder %s1315_s20, 1 }
  0x12   : > { %p1316_p5 = scmp.ge.s32.totalorder %s1771_s18, 1  ;;  %p295_p7 = scmp.lt.s32.totalorder %s1771_s18, 3 }
  0x13   : > { %p1891_p4 = por %p2175_p1, %p62_p0  ;;  %p1896_p6 = por %p288_p3, %p62_p0 }
  0x14   : > { %p1901_p8 = pnand %p1316_p5, %p295_p7  ;;  %s1773_s24 = smov [#allocation11]  }
  0x15   : > { %s2191_s22 = scalar_select %p1896_p6, 1, 0 }
  0x16   : > { %s307_s25 = sshll.u32 %s1773_s24, 4  ;;  %p1455_p9 = pneg %p1901_p8  ;;  %s308_s25 = int_to_ptr.vmem [resolvable:$true] %s307_s25 }
  0x17   : > { %2192 = sst [smem:[#allocation23_spill]] %s2191_s22  ;;  %s1774_s27 = smov [#allocation12]  }
  0x18   : > { %p1910_p11 = pnand %p1455_p9, %p2175_p1  ;;  %s323_s28 = sshll.u32 %s1774_s27, 4  ;;  %s324_s28 = int_to_ptr.vmem [resolvable:$true] %s323_s28 }
  0x19   : > { %s1582_s29 = scalar_lea.vmem %s308_s25, 256  ;;  %p1590_p5 = scmp.lt.s32.totalorder %s308_s25, %s308_s25 }
  0x1a   : > { %p1573_p12 = pneg %p1910_p11  ;;  %p1583_p13 = scmp.ne.s32.totalorder %s308_s25, %s1582_s29 }
  0x1b   : > { %p1591_p7 = scmp.lt.s32.totalorder %s1582_s29, %s1582_s29 }
  0x1c   : > { %p1585_p0 = pnand %p1583_p13, %p1573_p12 }
  0x1d   : > { %p1592_p10 = por %p1591_p7, %p1590_p5 }
  0x1e   : > { %p1586_p3 = pneg %p1585_p0 }
  0x20   : > { %p1593_p9 = pnand %p1592_p10, %p1586_p3 }
  0x22   : > { %1596 = shalt.err (!%p1593_p9)
}
  0x23   : > { %s1775_s30 = smov 64   ;;  %s1776_s11 = smov 4  }
  0x24   : > { %s2195_s2 = sld [smem:[#allocation27_spill]]  ;;  %s1608_s24 = scalar_lea.vmem %s324_s28, 256 }
  0x25   : > { %p1609_p1 = scmp.ne.s32.totalorder %s324_s28, %s1608_s24  ;;  %p1616_p2 = scmp.lt.s32.totalorder %s324_s28, %s324_s28 }
  0x26   : > { %p1617_p6 = scmp.lt.s32.totalorder %s1608_s24, %s1608_s24 }
  0x27   : > { %p1611_p13 = pnand %p1609_p1, %p1573_p12 }
  0x28   : > { %p1618_p5 = por %p1617_p6, %p1616_p2 }
  0x29   : > { %p1612_p0 = pneg %p1611_p13 }
  0x2a   : > { %1458 = dma.hbm_to_vmem [thread:$0]  (!%p1910_p11), %s2195_s2, 256, %s308_s25, [#allocation10], %s1775_s30, %s1775_s30, %s1776_s11  }
  0x2b   : > { %p1619_p10 = pnand %p1618_p5, %p1612_p0 }
  0x2d   : > { %1622 = shalt.err (!%p1619_p10)
}
  0x2e   : > { %s2196_s4 = sld [smem:[#allocation28_spill]]  ;;  %s42_s25 = sadd.s32 1, %s1767_s17 }
  0x2f   : > { %s49_s12 = sadd.s32 1, %s1759_s15  ;;  %p44_p1 = scmp.ge.s32.totalorder %s42_s25, 2 }
  0x30   : > { %p56_p2 = scmp.ne.s32.totalorder %s1759_s15, %s1755_s14  ;;  %p57_p6 = scmp.eq.s32.totalorder %s1771_s18, 0 }
  0x31   : > { %p1475_p12 = scmp.lt.s32.totalorder %s1771_s18, 2  ;;  %s2222_s25 = smov (%p44_p1, %s42_s25), 0 }
  0x32   : > { %2197 = sst [smem:[#allocation24_spill]] %s2222_s25  ;;  %p58_p3 = por %p57_p6, %p56_p2 }
  0x33   : > { %p2198_p7 = scmp.eq.s32.totalorder %s1882_s19, 1  ;;  %s46_s20 = ssub.s32 %s1767_s17, %s2222_s25 }
  0x34   : > { %1461 = dma.hbm_to_vmem [thread:$0]  (!%p1910_p11), %s2196_s4, 256, %s324_s28, [#allocation13], %s1775_s30, %s1775_s30, %s1776_s11  }
  0x35   : > { %p1942_p9 = por %p2198_p7, %p56_p2  ;;  %s1949_s24 = sand.u32 1, %s1759_s15  }
  0x36   : > { %p47_p11 = scmp.eq.s32.totalorder %s46_s20, 0  ;;  %s1320_s28 = sshll.u32 %s1949_s24, 3 }
  0x37   : > { %s1321_s30 = sshll.u32 %s1767_s17, 7  ;;  %s2201_s0 = sld [smem:[#allocation26_spill]] }
  0x38   : > { %s1954_s11 = scalar_select %p47_p11, %s1759_s15, %s49_s12  }
  0x39   : > { %s356_s4 = scalar_lea.vmem [#allocation6], %s1320_s28  ;;  %p1961_p13 = pnand %p1475_p12, %p58_p3 }
  0x3a   : > { %2200 = sst [smem:[#allocation25_spill]] %s1954_s11  ;;  %s363_s22 = sshll.u32 %s356_s4, 4  ;;  %s364_s22 = int_to_ptr.vmem [resolvable:$true] %s363_s22 }
  0x3b   : > { %s370_s25 = sand.u32 1, %s1771_s18   ;;  %s353_s20 = scalar_lea.sflag [#allocation7], %s1949_s24 }
  0x3c   : > { %p1625_p0 = pneg %p1961_p13  ;;  %s1636_s12 = scalar_lea.vmem %s364_s22, 128 }
  0x3d   : > { %s361_s2 = scalar_lea.hbm %s2201_s0, %s1321_s30  ;;  %p1637_p5 = scmp.ne.s32.totalorder %s364_s22, %s1636_s12 }
  0x3e   : > { %s1777_s28 = smov [#allocation6]  }
  0x3f   : > { %p1639_p10 = pnand %p1637_p5, %p1625_p0  ;;  %s1641_s4 = sshll.u32 %s1777_s28, 4  ;;  %s1642_s4 = int_to_ptr.vmem [resolvable:$false] %s1641_s4 }
  0x40   : > { %s1643_s30 = scalar_lea.vmem %s1642_s4, 256  ;;  %p1644_p2 = scmp.lt.s32.totalorder %s364_s22, %s1642_s4 }
  0x41   : > { %p1640_p1 = pneg %p1639_p10  ;;  %p1645_p6 = scmp.lt.s32.totalorder %s1643_s30, %s1636_s12 }
  0x43   : > { %p1646_p12 = por %p1645_p6, %p1644_p2 }
  0x45   : > { %p1647_p3 = pnand %p1646_p12, %p1640_p1 }
  0x47   : > { %1650 = shalt.err (!%p1647_p3)
}
  0x48   : > { %1465 = dma.hbm_to_vmem [thread:$0]  (!%p1961_p13), %s361_s2, 128, %s364_s22, %s353_s20  }
  0x49   : > { %s1322_s27 = sshll.u32 %s1767_s17, 4  ;;  %s373_s15 = scalar_lea.vmem [#allocation9], %s1949_s24 }
  0x4a   : > { %s378_s11 = scalar_lea.hbm %s2165_s1, %s1322_s27  ;;  %s380_s28 = sshll.u32 %s373_s15, 4  ;;  %s381_s28 = int_to_ptr.vmem [resolvable:$true] %s380_s28 }
  0x4b   : > { %s371_s18 = scalar_lea.sflag [#allocation10], %s370_s25  ;;  %s1664_s4 = scalar_lea.vmem %s381_s28, 16 }
  0x4c   : > { %p1665_p7 = scmp.ne.s32.totalorder %s381_s28, %s1664_s4  ;;  %s1778_s12 = smov [#allocation9]  }
  0x4d   : > { %s1669_s30 = sshll.u32 %s1778_s12, 4  ;;  %s1670_s30 = int_to_ptr.vmem [resolvable:$false] %s1669_s30 }
  0x4e   : > { %p1667_p11 = pnand %p1665_p7, %p1625_p0  ;;  %s1671_s10 = scalar_lea.vmem %s1670_s30, 32 }
  0x4f   : > { %p1672_p10 = scmp.lt.s32.totalorder %s381_s28, %s1670_s30  ;;  %p1673_p1 = scmp.lt.s32.totalorder %s1671_s10, %s1664_s4 }
  0x50   : > { %p1668_p5 = pneg %p1667_p11 }
  0x51   : > { %p1674_p2 = por %p1673_p1, %p1672_p10 }
  0x53   : > { %p1675_p6 = pnand %p1674_p2, %p1668_p5 }
  0x55   : > { %1678 = shalt.err (!%p1675_p6)
}
  0x56   : > { %1468 = dma.hbm_to_vmem [thread:$0]  (!%p1961_p13), %s378_s11, 16, %s381_s28, %s371_s18  }
  0x57   : > { %389 = sbr.rel (%p1901_p8) target bundleno = 1942 (0x796), region = 60  ;;  %s1987_s0 = sand.u32 (!%p1901_p8), 1, %s1755_s14  }
  0x58   : > { %s1324_s2 = sshll.u32 (!%p1901_p8), %s1987_s0, 3  ;;  %s392_s15 = scalar_lea.sflag (!%p1901_p8), [#allocation7], %s1987_s0 }
  0x59   : > { %s395_s10 = scalar_lea.vmem (!%p1901_p8), [#allocation6], %s1324_s2 }
  0x5c   : > { %1730 = dma.done.wait (%p1891_p4), %s392_s15, 128  }
  0x5d   : > { %1732 = vsyncadd (%p1891_p4), %s392_s15, 4294967168  ;;  %s400_s13 = sand.u32 1, %s1882_s19   ;;  %s403_s22 = scalar_lea.vmem [#allocation9], %s1987_s0 }
  0x5e   : > { %s401_s18 = scalar_lea.sflag [#allocation10], %s400_s13 }
  0x5f   : > { %1734 = dma.done.wait (%p1891_p4), %s401_s18, 16  }
  0x60   : > { %1736 = vsyncadd (%p1891_p4), %s401_s18, 4294967280  ;;  %p2203_p8 = scmp.eq.s32.totalorder %s1882_s19, 0 }
  0x62   : > { %1738 = dma.done.wait (%p2203_p8), [#allocation10], 256   ;;  %p2204_p13 = pmov %p2203_p8 }
  0x63   : > { %p2205_p0 = pmov %p2203_p8 }
  0x64   : > { %1740 = vsyncadd (%p2204_p13), [#allocation10], 4294967040 }
  0x65   : > { %1742 = dma.done.wait (%p2205_p0), [#allocation13], 256   ;;  %p2206_p12 = pmov %p2205_p0 }
  0x66   : > { %vm458_vm0 = vcmask 261120   ;;  %v457_v0 = vld [vmem:[%s395_s10] sm:$0xff]  ;;  %v1779_v8 = vmov 0.0   ;;  %vm1780_vm1 = vmmov 0   ;;  %v1548_v9 = vld [vmem:[#allocation11] sm:$0xff]   ;;  %vm558_vm2 = vcmask 60416  }
  0x67   : > { %1744 = vsyncadd (%p2206_p12), [#allocation13], 4294967040  ;;  %v459_v1 = vsel %vm458_vm0, %v457_v0, 0.0  ;;  %v1547_v7 = vld [vmem:[#allocation11 + $0x8] sm:$0xff]   ;;  %1377 = vmatprep.subr.bf16.mxu0 %v1779_v8  ;;  %1381 = vmatprep.mubr.msk.bf16.mxu0 %vm1780_vm1, %v1779_v8  ;;  %v1328_v14 = vld [vmem:[%s2170_s6] ss:$0 sm:$0xff] }
  0x68   : > { %460 = vadd.xlane.f32.xlu0 %v459_v1  ;;  %1378 = vmatpush3.bf16.msra.mxu0 %v1547_v7  ;;  %v1329_v16 = vld [vmem:[%s2171_s7] ss:$0 sm:$0xff]  ;;  %s1781_s20 = smov 80   ;;  %s1782_s27 = smov 96   ;;  %vm638_vm3 = vcmask 64512   ;;  %vm870_vm4 = vcmask 1043456  }
  0x69   : > { %1385 = vmatprep.subr.bf16.mxu1 %v1779_v8  ;;  %1379 = vmatprep.subr.bf16.mxu0 %v1779_v8  ;;  %v1330_v20 = vld [vmem:[%s2167_s3] ss:$0 sm:$0xff]  ;;  %s1783_s29 = smov 88   ;;  %s1784_s28 = smov 120   ;;  %vm1073_vm5 = vcmask 130048   ;;  %vm1075_vm6 = vcmask 195584  }
  0x6a   : > { %1387 = vmatprep.mubr.msk.bf16.mxu1 %vm1780_vm1, %v1779_v8  ;;  %s1785_s4 = smov 72   ;;  %s1786_s12 = smov 112   ;;  %v1335_v49 = vld [vmem:[%s403_s22] ss:$0 sm:$0xff] }
  0x6b   : > { %s1787_s30 = smov 104   ;;  %s1788_s15 = smov 64  }
  0x6c   : > { %1380 = vmatpush3.bf16.msra.mxu0 %v1548_v9  ;;  %s1789_s10 = smov 48   ;;  %s1790_s13 = smov 40  }
  0x6d   : > { %1391 = vmatprep.subr.bf16.mxu0 %v1779_v8  ;;  %s1791_s18 = smov 56   ;;  %s1792_s22 = smov 16  }
  0x6e   : > { %s1793_s19 = smov 8   ;;  %s1794_s21 = smov 24  }
  0xf1   : > { %v461_v2 = vpop.xlane.xlu0 %460 }
  0xf2   : > { %v463_v3 = vmul.f32 0.03125, %v461_v2 }
  0xf4   : > { %v464_v4 = vsub.f32 %v457_v0, %v463_v3 }
  0xf6   : > { %v465_v5 = vmul.f32 %v464_v4, %v464_v4 }
  0xf8   : > { %v466_v6 = vsel %vm458_vm0, %v465_v5, 0.0 }
  0xf9   : > { %467 = vadd.xlane.f32.xlu0 %v466_v6 }
 0x182   : > { %v468_v10 = vpop.xlane.xlu0 %467 }
 0x183   : > { %v469_v11 = vmul.f32 0.03125, %v468_v10 }
 0x185   : > { %v470_v12 = vadd.f32 1e-12, %v469_v11 }
 0x187   : > { %1551 = vrsqrt.f32 %v470_v12 }
 0x194   : > { %v1552_v13 = vpop.eup %1551 }
 0x195   : > { %v472_v15 = vmul.f32 %v1552_v13, %v464_v4 }
 0x197   : > { %v480_v17 = vmul.f32 %v1328_v14, %v472_v15 }
 0x199   : > { %v488_v18 = vadd.f32 %v1329_v16, %v480_v17 }
 0x19b   : > { %489 = vst.msk [vmem:[#allocation2] sm:$0xff] %vm458_vm0, %v488_v18  ;;  %v490_v19 = vpack.c.bf16 %v488_v18, %v488_v18 }
 0x19d   : > { %1382 = vmatmul.mubr.msk.bf16.vlgmr.msra.gmra.mxu0 %vm458_vm0, %v490_v19 }
 0x19e   : > { %1393 = vmatprep.mubr.msk.bf16.mxu0 %vm1780_vm1, %v1779_v8 }
 0x25d   : > { %v551_v21 = vpop.f32.mrf.mxu0 }
 0x25e   : > { %v552_v22 = vadd.f32 %v1330_v20, %v551_v21 }
 0x25f   : > { %v1383_v23 = vpop.f32.mrf.mxu0 }
 0x260   : > { %v2034_v24 = vpack.c.bf16 %v552_v22, %v552_v22 }
 0x261   : > { %v554_v25 = vpop.f32.mrf.mxu0 }
 0x262   : > { %591 = vrot.lane.b32.xlu0 %v2034_v24, %s1781_s20  ;;  %563 = vrot.lane.b32.xlu1 %v2034_v24, %s1782_s27  ;;  %559 = vst.msk [vmem:[#allocation3] sm:$0xf] %vm558_vm2, %v2034_v24 }
 0x263   : > { %v1384_v26 = vpop.f32.mrf.mxu0 }
 0x266   : > { %576 = vrot.lane.b32.xlu1 %v2034_v24, %s1783_s29  ;;  %s1351_s29 = sshll.u32 %s1763_s16, 7 }
 0x269   : > { %v621_v38 = vld [vmem:[#allocation3] sm:$0xf] }
 0x26a   : > { %571 = vrot.lane.b32.xlu1 %v2034_v24, %s1784_s28  ;;  %s451_s28 = scalar_lea.vmem [#allocation14], %s1324_s2 }
 0x26e   : > { %606 = vrot.lane.b32.xlu1 %v2034_v24, %s1785_s4  ;;  %s1192_s4 = sshll.u32 %s451_s28, 4  ;;  %s1193_s4 = int_to_ptr.vmem [resolvable:$true] %s1192_s4 }
 0x272   : > { %586 = vrot.lane.b32.xlu1 %v2034_v24, %s1786_s12 }
 0x276   : > { %601 = vrot.lane.b32.xlu1 %v2034_v24, %s1787_s30 }
 0x27a   : > { %567 = vrot.lane.b32.xlu1 %v2034_v24, %s1788_s15  ;;  %s2207_s15 = sld [smem:[#allocation29_spill]] }
 0x2d4   : > { %v592_v27 = vpop.permute.xlu0 %591  ;;  %v564_v28 = vpop.permute.xlu1 %563 }
 0x2d5   : > { %595 = vst.msk [vmem:[#allocation4 + $0x8] sm:$0xf] %vm558_vm2, %v592_v27  ;;  %566 = vst.msk [vmem:[#allocation4] sm:$0xf] %vm558_vm2, %v564_v28 }
 0x2d8   : > { %v577_v29 = vpop.permute.xlu1 %576 }
 0x2d9   : > { %580 = vst.msk [vmem:[#allocation4 + $0x4] sm:$0xf] %vm558_vm2, %v577_v29 }
 0x2dc   : > { %v572_v30 = vpop.permute.xlu1 %571  ;;  %v628_v31 = vld [vmem:[#allocation4] sm:$0xf]  ;;  %v630_v36 = vld [vmem:[#allocation4 + $0x8] sm:$0xf] }
 0x2dd   : > { %575 = vst.msk [vmem:[#allocation3 + $0x4] sm:$0xf] %vm558_vm2, %v572_v30  ;;  %v643_v32 = vsel %vm638_vm3, %v628_v31, 0  ;;  %v735_v39 = vsel %vm638_vm3, %v630_v36, 0 }
 0x2de   : > { %1386 = vmatpush3.bf16.xpose.msra.mxu1 %v643_v32 }
 0x2df   : > { %1397 = vmatprep.subr.bf16.mxu1 %v1779_v8 }
 0x2e0   : > { %v607_v33 = vpop.permute.xlu1 %606  ;;  %v629_v34 = vld [vmem:[#allocation4 + $0x4] sm:$0xf] }
 0x2e1   : > { %610 = vst.msk [vmem:[#allocation4 + $0xc] sm:$0xf] %vm558_vm2, %v607_v33  ;;  %v689_v35 = vsel %vm638_vm3, %v629_v34, 0 }
 0x2e2   : > { %1392 = vmatpush3.bf16.xpose.msra.mxu0 %v689_v35 }
 0x2e3   : > { %1403 = vmatprep.subr.bf16.mxu0 %v1779_v8 }
 0x2e4   : > { %v587_v37 = vpop.permute.xlu1 %586  ;;  %v622_v41 = vld [vmem:[#allocation3 + $0x4] sm:$0xf] }
 0x2e5   : > { %590 = vst.msk [vmem:[#allocation3 + $0x8] sm:$0xf] %vm558_vm2, %v587_v37  ;;  %1388 = vmatmul.mubr.msk.bf16.vlgmr.msra.gmra.mxu1 %vm638_vm3, %v621_v38 }
 0x2e6   : > { %1398 = vmatpush3.bf16.xpose.msra.mxu1 %v735_v39  ;;  %1399 = vmatprep.mubr.msk.bf16.mxu1 %vm1780_vm1, %v1779_v8 }
 0x2e7   : > { %1409 = vmatprep.subr.bf16.mxu1 %v1779_v8 }
 0x2e8   : > { %v602_v40 = vpop.permute.xlu1 %601  ;;  %v631_v42 = vld [vmem:[#allocation4 + $0xc] sm:$0xf] }
 0x2e9   : > { %605 = vst.msk [vmem:[#allocation3 + $0xc] sm:$0xf] %vm558_vm2, %v602_v40  ;;  %1394 = vmatmul.mubr.msk.bf16.vlgmr.msra.gmra.mxu0 %vm638_vm3, %v622_v41  ;;  %v781_v43 = vsel %vm638_vm3, %v631_v42, 0 }
 0x2ea   : > { %1404 = vmatpush3.bf16.xpose.msra.mxu0 %v781_v43  ;;  %1405 = vmatprep.mubr.msk.bf16.mxu0 %vm1780_vm1, %v1779_v8 }
 0x2eb   : > { %1415 = vmatprep.subr.bf16.mxu0 %v1779_v8 }
 0x2ec   : > { %v568_v44 = vpop.permute.xlu1 %567  ;;  %v623_v45 = vld [vmem:[#allocation3 + $0x8] sm:$0xf] }
 0x2ed   : > { %570 = vst.msk [vmem:[#allocation5] sm:$0xf] %vm558_vm2, %v568_v44  ;;  %1400 = vmatmul.mubr.msk.bf16.vlgmr.msra.gmra.mxu1 %vm638_vm3, %v623_v45 }
 0x2ee   : > { %1411 = vmatprep.mubr.msk.bf16.mxu1 %vm1780_vm1, %v1779_v8 }
 0x2f0   : > { %v624_v46 = vld [vmem:[#allocation3 + $0xc] sm:$0xf] }
 0x2f1   : > { %1406 = vmatmul.mubr.msk.bf16.vlgmr.msra.gmra.mxu0 %vm638_vm3, %v624_v46  ;;  %v1549_v46 = vld [vmem:[#allocation12 + $0x8] sm:$0xff]  }
 0x2f2   : > { %1417 = vmatprep.mubr.msk.bf16.mxu0 %vm1780_vm1, %v1779_v8 }
 0x2f4   : > { %v863_v47 = vld [vmem:[#allocation5] sm:$0xf] }
 0x2f5   : > { %v872_v48 = vsel %vm870_vm4, %v863_v47, 0 }
 0x2f6   : > { %1410 = vmatpush3.bf16.msra.mxu1 %v872_v48 }
 0x2f7   : > { %1421 = vmatprep.subr.bf16.mxu1 %v1779_v8 }
 0x3a5   : > { %v679_v50 = vpop.f32.mrf.mxu1 }
 0x3a6   : > { %v680_v51 = vadd.f32 %v1335_v49, %v679_v50 }
 0x3a7   : > { %v1389_v52 = vpop.f32.mrf.mxu1 }
 0x3a8   : > { %v823_v53 = vsel %vm638_vm3, %v680_v51, -inf }
 0x3a9   : > { %824 = vmax.xlane.f32.xlu1 %v823_v53  ;;  %v682_v54 = vpop.f32.mrf.mxu1  ;;  %v725_v55 = vpop.f32.mrf.mxu0 }
 0x3aa   : > { %v726_v56 = vadd.f32 %v1335_v49, %v725_v55 }
 0x3ab   : > { %v1390_v57 = vpop.f32.mrf.mxu1  ;;  %v1395_v58 = vpop.f32.mrf.mxu0 }
 0x3ac   : > { %v826_v59 = vsel %vm638_vm3, %v726_v56, -inf }
 0x3ad   : > { %v771_v60 = vpop.f32.mrf.mxu1  ;;  %827 = vmax.xlane.f32.xlu0 %v826_v59  ;;  %v728_v61 = vpop.f32.mrf.mxu0 }
 0x3ae   : > { %v772_v62 = vadd.f32 %v1335_v49, %v771_v60 }
 0x3af   : > { %v1396_v63 = vpop.f32.mrf.mxu0  ;;  %v1401_v0 = vpop.f32.mrf.mxu1 }
 0x3b0   : > { %v829_v1 = vsel %vm638_vm3, %v772_v62, -inf }
 0x3b1   : > { %830 = vmax.xlane.f32.xlu1 %v829_v1  ;;  %v774_v2 = vpop.f32.mrf.mxu1  ;;  %v817_v3 = vpop.f32.mrf.mxu0 }
 0x3b2   : > { %v818_v4 = vadd.f32 %v1335_v49, %v817_v3 }
 0x3b3   : > { %v1402_v5 = vpop.f32.mrf.mxu1  ;;  %v1407_v6 = vpop.f32.mrf.mxu0 }
 0x3b4   : > { %v832_v7 = vsel %vm638_vm3, %v818_v4, -inf }
 0x3b5   : > { %833 = vmax.xlane.f32.xlu0 %v832_v7  ;;  %v820_v9 = vpop.f32.mrf.mxu0 }
 0x3b7   : > { %v1408_v10 = vpop.f32.mrf.mxu0 }
 0x3c2   : > { %596 = vrot.lane.b32.xlu1 %v2034_v24, %s1789_s10  ;;  %s2208_s10 = smov %s2207_s15 }
 0x3c6   : > { %611 = vrot.lane.b32.xlu1 %v2034_v24, %s1790_s13  ;;  %s1190_s13 = scalar_lea.hbm %s2207_s15, %s1351_s29 }
 0x3cb   : > { %581 = vrot.lane.b32.xlu0 %v2034_v24, %s1791_s18  ;;  %s1178_s18 = scalar_lea.sflag [#allocation8], %s1987_s0 }
 0x432   : > { %v825_v11 = vpop.xlane.xlu1 %824 }
 0x433   : > { %v835_v12 = vsub.f32 %v680_v51, %v825_v11  ;;  %v1550_v51 = vld [vmem:[#allocation12] sm:$0xff]  }
 0x435   : > { %v839_v13 = vmul.f32 1.442695, %v835_v12 }
 0x436   : > { %v828_v14 = vpop.xlane.xlu0 %827 }
 0x437   : > { %1553 = vpow2.f32 %v839_v13  ;;  %v836_v15 = vsub.f32 %v726_v56, %v828_v14 }
 0x439   : > { %v841_v16 = vmul.f32 1.442695, %v836_v15 }
 0x43a   : > { %v831_v17 = vpop.xlane.xlu1 %830 }
 0x43b   : > { %1555 = vpow2.f32 %v841_v16  ;;  %v837_v18 = vsub.f32 %v772_v62, %v831_v17  ;;  %v1344_v17 = vld [vmem:[%s2169_s5] ss:$0 sm:$0xff] }
 0x43d   : > { %v843_v19 = vmul.f32 1.442695, %v837_v18 }
 0x43e   : > { %v597_v20 = vpop.permute.xlu1 %596  ;;  %v834_v21 = vpop.xlane.xlu0 %833 }
 0x43f   : > { %1557 = vpow2.f32 %v843_v19  ;;  %600 = vst.msk [vmem:[#allocation5 + $0x8] sm:$0xf] %vm558_vm2, %v597_v20  ;;  %v838_v22 = vsub.f32 %v818_v4, %v834_v21  ;;  %v626_v21 = vld [vmem:[#allocation2] sm:$0xff] }
 0x441   : > { %v845_v23 = vmul.f32 1.442695, %v838_v22 }
 0x442   : > { %v612_v25 = vpop.permute.xlu1 %611  ;;  %v582_v24 = vpop.permute.xlu0 %581 }
 0x443   : > { %1559 = vpow2.f32 %v845_v23  ;;  %615 = vst.msk [vmem:[#allocation5 + $0xc] sm:$0xf] %vm558_vm2, %v612_v25  ;;  %585 = vst.msk [vmem:[#allocation5 + $0x4] sm:$0xf] %vm558_vm2, %v582_v24 }
 0x444   : > { %v1554_v26 = vpop.eup %1553 }
 0x445   : > { %v859_v27 = vpack.c.bf16 %v1554_v26, %v1554_v26  ;;  %v847_v42 = vsel %vm638_vm3, %v1554_v26, 0.0 }
 0x446   : > { %v865_v28 = vld [vmem:[#allocation5 + $0x8] sm:$0xf] }
 0x447   : > { %1412 = vmatmul.mubr.msk.bf16.vlgmr.msra.gmra.mxu1 %vm638_vm3, %v859_v27  ;;  %v964_v29 = vsel %vm870_vm4, %v865_v28, 0 }
 0x448   : > { %v1556_v30 = vpop.eup %1555  ;;  %1422 = vmatpush3.bf16.msra.mxu1 %v964_v29  ;;  %1423 = vmatprep.mubr.msk.bf16.mxu1 %vm1780_vm1, %v1779_v8 }
 0x449   : > { %v850_v31 = vsel %vm638_vm3, %v1556_v30, 0.0  ;;  %1433 = vmatprep.subr.bf16.mxu1 %v1779_v8  ;;  %v860_v37 = vpack.c.bf16 %v1556_v30, %v1556_v30 }
 0x44a   : > { %851 = vadd.xlane.f32.xlu0 %v850_v31  ;;  %v864_v32 = vld [vmem:[#allocation5 + $0x4] sm:$0xf]  ;;  %v866_v35 = vld [vmem:[#allocation5 + $0xc] sm:$0xf] }
 0x44b   : > { %v918_v33 = vsel %vm870_vm4, %v864_v32, 0  ;;  %v1010_v39 = vsel %vm870_vm4, %v866_v35, 0  ;;  %v1348_v35 = vld [vmem:[%s2172_s8] ss:$0 sm:$0xff] }
 0x44c   : > { %v1558_v34 = vpop.eup %1557  ;;  %1416 = vmatpush3.bf16.msra.mxu0 %v918_v33 }
 0x44d   : > { %v853_v36 = vsel %vm638_vm3, %v1558_v34, 0.0  ;;  %v861_v38 = vpack.c.bf16 %v1558_v34, %v1558_v34  ;;  %1427 = vmatprep.subr.bf16.mxu0 %v1779_v8 }
 0x44e   : > { %854 = vadd.xlane.f32.xlu1 %v853_v36 }
 0x44f   : > { %1418 = vmatmul.mubr.msk.bf16.vlgmr.msra.gmra.mxu0 %vm638_vm3, %v860_v37  ;;  %1424 = vmatmul.mubr.msk.bf16.vlgmr.msra.gmra.mxu1 %vm638_vm3, %v861_v38  ;;  %v1349_v37 = vld [vmem:[%s2173_s9] ss:$0 sm:$0xff] }
 0x450   : > { %v1560_v40 = vpop.eup %1559  ;;  %1428 = vmatpush3.bf16.msra.mxu0 %v1010_v39  ;;  %1429 = vmatprep.mubr.msk.bf16.mxu0 %vm1780_vm1, %v1779_v8 }
 0x451   : > { %v856_v41 = vsel %vm638_vm3, %v1560_v40, 0.0  ;;  %1437 = vmatprep.mubr.msk.bf16.mxu1 %vm1780_vm1, %v1779_v8  ;;  %v862_v43 = vpack.c.bf16 %v1560_v40, %v1560_v40  ;;  %1434 = vmatpush3.bf16.msra.mxu1 %v1549_v46 }
 0x452   : > { %857 = vadd.xlane.f32.xlu0 %v856_v41  ;;  %1435 = vmatprep.subr.bf16.mxu1 %v1779_v8 }
 0x455   : > { %1436 = vmatpush3.bf16.msra.mxu1 %v1550_v51 }
 0x456   : > { %848 = vadd.xlane.f32.xlu0 %v847_v42 }
 0x457   : > { %1430 = vmatmul.mubr.msk.bf16.vlgmr.msra.gmra.mxu0 %vm638_vm3, %v862_v43 }
 0x4d3   : > { %v852_v44 = vpop.xlane.xlu0 %851 }
 0x4d4   : > { %1561 = vrcp.f32 %v852_v44 }
 0x4d7   : > { %v855_v45 = vpop.xlane.xlu1 %854 }
 0x4d8   : > { %1563 = vrcp.f32 %v855_v45 }
 0x4db   : > { %v858_v47 = vpop.xlane.xlu0 %857 }
 0x4dc   : > { %1565 = vrcp.f32 %v858_v47 }
 0x4df   : > { %v849_v6 = vpop.xlane.xlu0 %848 }
 0x4e0   : > { %1567 = vrcp.f32 %v849_v6 }
 0x4e1   : > { %v1562_v53 = vpop.eup %1561 }
 0x4e5   : > { %v1564_v54 = vpop.eup %1563 }
 0x4e9   : > { %v1566_v0 = vpop.eup %1565 }
 0x4ed   : > { %v1568_v7 = vpop.eup %1567 }
 0x507   : > { %v908_v48 = vpop.f32.mrf.mxu1 }
 0x508   : > { %v1056_v10 = vmul.f32 %v1568_v7, %v908_v48 }
 0x509   : > { %v1413_v49 = vpop.f32.mrf.mxu1 }
 0x50b   : > { %v911_v50 = vpop.f32.mrf.mxu1 }
 0x50d   : > { %v1414_v52 = vpop.f32.mrf.mxu1 }
 0x50f   : > { %v954_v55 = vpop.f32.mrf.mxu0  ;;  %v1000_v56 = vpop.f32.mrf.mxu1 }
 0x510   : > { %v1057_v57 = vmul.f32 %v1562_v53, %v954_v55  ;;  %v1058_v58 = vmul.f32 %v1564_v54, %v1000_v56 }
 0x511   : > { %v1419_v59 = vpop.f32.mrf.mxu0  ;;  %v1425_v60 = vpop.f32.mrf.mxu1 }
 0x512   : > { %1065 = vrot.lane.b32.xlu0 %v1058_v58, %s1792_s22  ;;  %1061 = vrot.lane.b32.xlu1 %v1057_v57, %s1793_s19  ;;  %s1679_s22 = scalar_lea.vmem %s1193_s4, 128  ;;  %s1795_s19 = smov [#allocation14]  }
 0x513   : > { %v957_v61 = vpop.f32.mrf.mxu0  ;;  %v1003_v8 = vpop.f32.mrf.mxu1  ;;  %p1680_p4 = scmp.ne.s32.totalorder %s1193_s4, %s1679_s22  ;;  %s1683_s16 = sshll.u32 %s1795_s19, 4  ;;  %s1684_s16 = int_to_ptr.vmem [resolvable:$false] %s1683_s16 }
 0x514   : > { %s1685_s2 = scalar_lea.vmem %s1684_s16, 256  ;;  %p1686_p11 = scmp.lt.s32.totalorder %s1193_s4, %s1684_s16 }
 0x515   : > { %v1420_v62 = vpop.f32.mrf.mxu0  ;;  %v1426_v63 = vpop.f32.mrf.mxu1  ;;  %p1681_p3 = pnand %p1680_p4, %p1942_p9  ;;  %p1687_p5 = scmp.lt.s32.totalorder %s1685_s2, %s1679_s22 }
 0x517   : > { %v1046_v1 = vpop.f32.mrf.mxu0  ;;  %p1682_p7 = pneg %p1681_p3  ;;  %p1688_p10 = por %p1687_p5, %p1686_p11 }
 0x518   : > { %v1059_v2 = vmul.f32 %v1566_v0, %v1046_v1 }
 0x519   : > { %v1431_v3 = vpop.f32.mrf.mxu0  ;;  %p1689_p1 = pnand %p1688_p10, %p1682_p7 }
 0x51a   : > { %1069 = vrot.lane.b32.xlu1 %v1059_v2, %s1794_s21 }
 0x51b   : > { %v1049_v4 = vpop.f32.mrf.mxu0 }
 0x51d   : > { %v1432_v5 = vpop.f32.mrf.mxu0 }
 0x584   : > { %v1062_v9 = vpop.permute.xlu1 %1061  ;;  %v1066_v11 = vpop.permute.xlu0 %1065 }
 0x585   : > { %v1072_v12 = vsel %vm638_vm3, %v1056_v10, %v1062_v9 }
 0x586   : > { %v1074_v13 = vsel %vm1073_vm5, %v1072_v12, %v1066_v11 }
 0x58c   : > { %v1070_v14 = vpop.permute.xlu1 %1069 }
 0x58d   : > { %v1076_v15 = vsel %vm1075_vm6, %v1074_v13, %v1070_v14 }
 0x58e   : > { %v1077_v16 = vpack.c.bf16 %v1076_v15, %v1076_v15 }
 0x590   : > { %1438 = vmatmul.mubr.msk.bf16.vlgmr.msra.gmra.mxu1 %vm458_vm0, %v1077_v16 }
 0x650   : > { %v1139_v18 = vpop.f32.mrf.mxu1 }
 0x651   : > { %v1140_v19 = vadd.f32 %v1344_v17, %v1139_v18 }
 0x652   : > { %v1439_v20 = vpop.f32.mrf.mxu1 }
 0x653   : > { %v1145_v22 = vadd.f32 %v1140_v19, %v626_v21 }
 0x654   : > { %v1142_v23 = vpop.f32.mrf.mxu1 }
 0x655   : > { %v1146_v25 = vsel %vm458_vm0, %v1145_v22, 0.0 }
 0x656   : > { %v1440_v24 = vpop.f32.mrf.mxu1  ;;  %1147 = vadd.xlane.f32.xlu1 %v1146_v25 }
 0x6df   : > { %v1148_v26 = vpop.xlane.xlu1 %1147 }
 0x6e0   : > { %v1150_v27 = vmul.f32 0.03125, %v1148_v26 }
 0x6e2   : > { %v1151_v28 = vsub.f32 %v1145_v22, %v1150_v27 }
 0x6e4   : > { %v1152_v29 = vmul.f32 %v1151_v28, %v1151_v28 }
 0x6e6   : > { %v1153_v30 = vsel %vm458_vm0, %v1152_v29, 0.0 }
 0x6e7   : > { %1154 = vadd.xlane.f32.xlu0 %v1153_v30 }
 0x770   : > { %v1155_v31 = vpop.xlane.xlu0 %1154 }
 0x771   : > { %v1156_v32 = vmul.f32 0.03125, %v1155_v31 }
 0x773   : > { %v1157_v33 = vadd.f32 1e-12, %v1156_v32 }
 0x775   : > { %1569 = vrsqrt.f32 %v1157_v33 }
 0x782   : > { %v1570_v34 = vpop.eup %1569 }
 0x783   : > { %v1159_v36 = vmul.f32 %v1570_v34, %v1151_v28 }
 0x785   : > { %v1167_v38 = vmul.f32 %v1348_v35, %v1159_v36 }
 0x787   : > { %v1175_v39 = vadd.f32 %v1349_v37, %v1167_v38 }
 0x789   : > { %1176 = vst.msk [vmem:[%s451_s28] sm:$0xff] %vm458_vm0, %v1175_v39 }
 0x78a   : > { %1692 = shalt.err (!%p1689_p1)
}
 0x78b   : > { %s1693_s21 = scalar_lea.hbm %s1190_s13, 128  ;;  %s1697_s25 = scalar_lea.hbm %s2208_s10, 256 }
 0x78c   : > { %p1694_p2 = scmp.ne.s32.totalorder %s1190_s13, %s1693_s21  ;;  %p1698_p13 = scmp.lt.s32.totalorder %s1190_s13, %s2208_s10 }
 0x78d   : > { %p1699_p0 = scmp.lt.s32.totalorder %s1697_s25, %s1693_s21 }
 0x78e   : > { %p1695_p6 = pnand %p1694_p2, %p1942_p9 }
 0x78f   : > { %p1700_p12 = por %p1699_p0, %p1698_p13 }
 0x790   : > { %p1696_p8 = pneg %p1695_p6 }
 0x792   : > { %p1701_p4 = pnand %p1700_p12, %p1696_p8 }
 0x794   : > { %1704 = shalt.err (!%p1701_p4)
}
 0x795   : > { %1453 = dma.vmem_to_hbm [thread:$0]  (%p1942_p9), %s1193_s4, 128, %s1190_s13, %s1178_s18  }
 0x796 PF: > { %s2209_s20 = sld [smem:[#allocation20_spill]] }
 0x797   : > { %s2210_s27 = sld [smem:[#allocation23_spill]] }
 0x798   : > { %s2211_s29 = sld [smem:[#allocation22_spill]] }
 0x79c   : > { %s1204_s28 = sand.u32 1, %s2209_s20  }
 0x79d   : > { %p2212_p3 = scmp.ne.s32.totalorder %s2210_s27, 0  ;;  %s1205_s12 = scalar_lea.sflag [#allocation8], %s1204_s28 }
 0x79e   : > { %p2213_p7 = scmp.ge.s32.totalorder %s2211_s29, 2 }
 0x7a0   : > { %p1470_p11 = pnand %p2213_p7, %p2212_p3 }
 0x7a2   : > { %p1471_p5 = pneg %p1470_p11 }
 0x7a4   : > { %1746 = dma.done.wait (%p1471_p5), %s1205_s12, 128  }
 0x7a5   : > { %1748 = vsyncadd (%p1471_p5), %s1205_s12, 4294967168  ;;  %s30_s18 = sadd.s32 1, %s2211_s29   ;;  %s2214_s30 = sld [smem:[#allocation21_spill]] }
 0x7a6   : > { %p27_p10 = scmp.ge.s32.totalorder %s30_s18, 4   ;;  %s2215_s15 = sld [smem:[#allocation25_spill]] }
 0x7a7   : > { %s2216_s26 = sld [smem:[#allocation24_spill]]  ;;  %s2217_s13 = smov %s1755_s14 }
 0x7a8   : > { %s2219_s16 = smov %s1767_s17 }
 0x7a9   :  { %29 = sbr.rel (!%p27_p10) target bundleno = 14 (0xe), region = 141 }
 0x7ab   : > { %s2218_s14 = smov %s2214_s30 }
 0x7ad   : > { %s2220_s17 = smov %s2216_s26 }
 0x7ae   :  { %1210 = vsyncpa [#allocation7], 1 }
 0x7af   :  { %1212 = vsyncpa [#allocation7 + $0x1], 1 }
 0x7b0   :  { %1213 = vsyncpa [#allocation10], 1 }
 0x7b1   :  { %1215 = vsyncpa [#allocation10 + $0x1], 1 }
 0x7b2   :  { %1216 = vsyncpa [#allocation13], 1 }
 0x7b3   :  { %1217 = vsyncpa [#allocation8], 1 }
 0x7b4   :  { %1219 = vsyncpa [#allocation8 + $0x1], 1 }

</bundles_post_ra>
